<compile_context>
chip_gen: v7x
topology: tpu7x:2x2x1
jax: 0.10.0
libtpu: 0.0.40
codegen_flags: <defaults>
</compile_context>

<pallas_src>
import functools

import jax
import jax.numpy as jnp
import numpy as np
from jax.experimental import pallas as pl
from jax.experimental.pallas import tpu as pltpu


def _withball_kernel(alpha_ref, beta_ref, x_ref, out_ref, *, n_agents, state_dim):
    # x_ref:   (n_agents*state_dim, tm) VMEM tile, dim-major rows:
    #          row d*n_agents + a  ==  coordinate d of agent a  (a=0 is the ball)
    # out_ref: (n_agents-1, tm)
    n_players = n_agents - 1

    alpha = alpha_ref[0]                     # SMEM scalar
    inv = jnp.exp(-beta_ref[0])              # 1 / exp(beta)   (scalar, EUP)
    inv_sq = inv * inv
    alpha_scaled = alpha * inv

    # Vectorized over all players at once: every op below is (n_players, tm).
    ssq = None
    for d in range(state_dim):               # unrolled, static contiguous slices
        base = d * n_agents
        ball_d = x_ref[base:base + 1, :]                   # (1, tm)
        players_d = x_ref[base + 1:base + n_agents, :]     # (n_players, tm)
        diff = players_d - ball_d                          # sublane broadcast
        sq = diff * diff
        ssq = sq if ssq is None else ssq + sq

    # sigmoid((alpha - sqrt(ssq)) / e^beta) == sigmoid(alpha*inv - sqrt(ssq*inv^2))
    z = alpha_scaled - jnp.sqrt(ssq * inv_sq)
    out_ref[...] = jax.nn.sigmoid(z)          # one lane-dense store, no concat


def _round_up(v, m):
    return ((v + m - 1) // m) * m


def with_ball_forward(states, alpha, beta, *, tm_max=32768, min_steps_if_large=2,
                      large_m=4096):
    """states: [batch, length, n_agents, state_dim] -> [batch, length, n_agents-1, 1]."""
    batch, length, n_agents, state_dim = states.shape
    n_players = n_agents - 1
    feat = n_agents * state_dim
    M = batch * length

    # One relayout pass: dim-major feature slab with M on the lane axis: [feat, M].
    # x[d*n_agents + a, b*length + l] == states[b, l, a, d]
    x = jnp.transpose(states.astype(jnp.float32), (3, 2, 0, 1)).reshape(feat, M)

    # Tile selection (no jnp.pad anywhere):
    #   * small M: one full-extent block (tm == M), exact, no masking;
    #   * large M: 128-aligned blocks <= tm_max, at least `min_steps_if_large`
    #     grid steps so both v7x TensorCores get work; ragged last block is
    #     masked by Pallas automatically.
    tm_max = max(128, (tm_max // 128) * 128)
    n_steps = pl.cdiv(M, tm_max)
    if M >= large_m:
        n_steps = max(n_steps, min_steps_if_large)
    if n_steps == 1:
        tm = M
    else:
        tm = min(_round_up(pl.cdiv(M, n_steps), 128), tm_max)
    grid = (pl.cdiv(M, tm),)

    kernel = functools.partial(_withball_kernel, n_agents=n_agents,
                               state_dim=state_dim)

    out = pl.pallas_call(
        kernel,
        out_shape=jax.ShapeDtypeStruct((n_players, M), jnp.float32),
        grid_spec=pltpu.PrefetchScalarGridSpec(
            num_scalar_prefetch=0,
            grid=grid,
            in_specs=[
                pl.BlockSpec(memory_space=pltpu.MemorySpace.SMEM),  # alpha (1,)
                pl.BlockSpec(memory_space=pltpu.MemorySpace.SMEM),  # beta  (1,)
                pl.BlockSpec((feat, tm), lambda i: (0, i)),         # states slab
            ],
            out_specs=pl.BlockSpec((n_players, tm), lambda i: (0, i)),
        ),
        compiler_params=pltpu.CompilerParams(
            dimension_semantics=("parallel",),
        ),
    )(alpha, beta, x)

    # Layout plumbing only: [n_players, M] -> [batch, length, n_players, 1].
    return out.T.reshape(batch, length, n_players, 1)


def with_ball_reference(states, alpha, beta):
    """Plain-JAX reference mirroring the PyTorch module (trinary=False)."""
    ball = states[:, :, :1, :]
    players = states[:, :, 1:, :]
    diff = players - ball
    dists = jnp.sqrt(jnp.sum(diff * diff, axis=-1, keepdims=True))
    return jax.nn.sigmoid((alpha[0] - dists) / jnp.exp(beta[0]))


if __name__ == "__main__":
    key = jax.random.PRNGKey(0)
    k_states, k_alpha = jax.random.split(key)

    # Small shapes consistent with the module: [batch, length, n_agents, state_dim]
    batch, length, n_agents, state_dim = 2, 16, 4, 3
    states = jax.random.normal(
        k_states, (batch, length, n_agents, state_dim), dtype=jnp.float32
    )

    # SoftSmall parameter init: alpha ~ N(0,1), beta defaults to 0.0.
    alpha = jax.random.normal(k_alpha, (1,), dtype=jnp.float32)
    beta = jnp.zeros((1,), dtype=jnp.float32)

    out = with_ball_forward(states, alpha, beta)
    out = jax.block_until_ready(out)

    ref = with_ball_reference(states, alpha, beta)
    np.testing.assert_allclose(np.asarray(out), np.asarray(ref), rtol=1e-5, atol=1e-5)
    assert out.shape == (batch, length, n_agents - 1, 1)

    print("KERNEL_OK")
</pallas_src>

<mosaic_0001>
module attributes {stable_mosaic.version = 11 : i64} {
  func.func @_withball_kernel(%arg0: i32, %arg1: memref<1xf32, #tpu.memory_space<smem>>, %arg2: memref<1xf32, #tpu.memory_space<smem>>, %arg3: memref<12x32xf32, #tpu.memory_space<vmem>>, %arg4: memref<3x32xf32, #tpu.memory_space<vmem>>) attributes {dimension_semantics = [#tpu.dimension_semantics<parallel>], iteration_bounds = array<i64: 1>, scalar_prefetch = 0 : i64, scratch_operands = 0 : i64, tpu.core_type = #tpu.core_type<tc>, window_params = [{transform_indices = @transform_0, window_bounds = array<i64: 1>}, {transform_indices = @transform_1, window_bounds = array<i64: 1>}, {transform_indices = @transform_2, window_bounds = array<i64: 12, 32>}, {transform_indices = @transform_3, window_bounds = array<i64: 3, 32>}]} {
    %c0 = arith.constant 0 : index
    %0 = memref.load %arg1[%c0] : memref<1xf32, #tpu.memory_space<smem>>
    %c0_0 = arith.constant 0 : index
    %1 = memref.load %arg2[%c0_0] : memref<1xf32, #tpu.memory_space<smem>>
    %cst = arith.constant 0.000000e+00 : f32
    %2 = arith.subf %cst, %1 : f32
    %3 = math.exp %2 : f32
    %4 = arith.mulf %3, %3 : f32
    %5 = arith.mulf %0, %3 : f32
    %c0_1 = arith.constant 0 : index
    %c0_2 = arith.constant 0 : index
    %6 = vector.load %arg3[%c0_1, %c0_2] : memref<12x32xf32, #tpu.memory_space<vmem>>, vector<1x32xf32>
    %c1 = arith.constant 1 : index
    %c0_3 = arith.constant 0 : index
    %7 = vector.load %arg3[%c1, %c0_3] : memref<12x32xf32, #tpu.memory_space<vmem>>, vector<3x32xf32>
    %8 = vector.broadcast %6 : vector<1x32xf32> to vector<3x32xf32>
    %9 = arith.subf %7, %8 : vector<3x32xf32>
    %10 = arith.mulf %9, %9 : vector<3x32xf32>
    %c4 = arith.constant 4 : index
    %c0_4 = arith.constant 0 : index
    %11 = vector.load %arg3[%c4, %c0_4] : memref<12x32xf32, #tpu.memory_space<vmem>>, vector<1x32xf32>
    %c5 = arith.constant 5 : index
    %c0_5 = arith.constant 0 : index
    %12 = vector.load %arg3[%c5, %c0_5] : memref<12x32xf32, #tpu.memory_space<vmem>>, vector<3x32xf32>
    %13 = vector.broadcast %11 : vector<1x32xf32> to vector<3x32xf32>
    %14 = arith.subf %12, %13 : vector<3x32xf32>
    %15 = arith.mulf %14, %14 : vector<3x32xf32>
    %16 = arith.addf %10, %15 : vector<3x32xf32>
    %c8 = arith.constant 8 : index
    %c0_6 = arith.constant 0 : index
    %17 = vector.load %arg3[%c8, %c0_6] : memref<12x32xf32, #tpu.memory_space<vmem>>, vector<1x32xf32>
    %c9 = arith.constant 9 : index
    %c0_7 = arith.constant 0 : index
    %18 = vector.load %arg3[%c9, %c0_7] : memref<12x32xf32, #tpu.memory_space<vmem>>, vector<3x32xf32>
    %19 = vector.broadcast %17 : vector<1x32xf32> to vector<3x32xf32>
    %20 = arith.subf %18, %19 : vector<3x32xf32>
    %21 = arith.mulf %20, %20 : vector<3x32xf32>
    %22 = arith.addf %16, %21 : vector<3x32xf32>
    %23 = vector.broadcast %4 : f32 to vector<3x32xf32>
    %24 = arith.mulf %22, %23 : vector<3x32xf32>
    %25 = math.sqrt %24 : vector<3x32xf32>
    %26 = vector.broadcast %5 : f32 to vector<3x32xf32>
    %27 = arith.subf %26, %25 : vector<3x32xf32>
    %28 = arith.negf %27 : vector<3x32xf32>
    %29 = math.exp %28 : vector<3x32xf32>
    %cst_8 = arith.constant 1.000000e+00 : f32
    %30 = vector.broadcast %cst_8 : f32 to vector<3x32xf32>
    %31 = arith.addf %30, %29 : vector<3x32xf32>
    %32 = arith.divf %30, %31 : vector<3x32xf32>
    %c0_9 = arith.constant 0 : index
    %c0_10 = arith.constant 0 : index
    %33 = vector.load %arg4[%c0_9, %c0_10] : memref<3x32xf32, #tpu.memory_space<vmem>>, vector<3x32xf32>
    tpu.vector_store %arg4[%c0_9, %c0_10], %32 {strides = array<i32>} : memref<3x32xf32, #tpu.memory_space<vmem>>, vector<3x32xf32>,
    return
  }
  func.func @transform_0(%arg0: i32) -> i32 {
    %c0_i32 = arith.constant 0 : i32
    %c0_i32_0 = arith.constant 0 : i32
    return %c0_i32 : i32
  }
  func.func @transform_1(%arg0: i32) -> i32 {
    %c0_i32 = arith.constant 0 : i32
    %c0_i32_0 = arith.constant 0 : i32
    return %c0_i32 : i32
  }
  func.func @transform_2(%arg0: i32) -> (i32, i32) {
    %c0_i32 = arith.constant 0 : i32
    %c0_i32_0 = arith.constant 0 : i32
    return %c0_i32, %arg0 : i32, i32
  }
  func.func @transform_3(%arg0: i32) -> (i32, i32) {
    %c0_i32 = arith.constant 0 : i32
    %c0_i32_0 = arith.constant 0 : i32
    return %c0_i32, %arg0 : i32, i32
  }
}

</mosaic_0001>

<bundles_post_ra>
// kernel: tpu_custom_call.1
= control target key start
LH: loop header
LB: loop body
LE: loop exit
PB: predicated region body
PF: predicated region fallthrough
CT: control target
= control target key end

     0   :  { %10 = vsyncpa [#allocation5], 0  ;;  %s220_s0 = inlined_call_operand.<no memory space> [shape: f32[1], index: 0, kind: input, shape index: {}]   ;;  %s221_s1 = inlined_call_operand.<no memory space> [shape: f32[1], index: 1, kind: input, shape index: {}]   ;;  %s222_s2 = inlined_call_operand.hbm [shape: f32[12,32], index: 2, kind: input, shape index: {}]   ;;  %s223_s3 = inlined_call_operand.hbm [shape: f32[3,32], index: 3, kind: output, shape index: {}]  }
   0x1   :  { %11 = vsyncpa [#allocation6], 0  ;;  %s166_s12 = smov [#allocation4]   ;;  %s118_s16 = scalar_lea.hbm %s222_s2, 256 }
   0x2   :  { %s21_s13 = sshll.u32 %s166_s12, 4  ;;  %p119_p0 = scmp.ne.s32.totalorder %s222_s2, %s118_s16  ;;  %s22_s13 = int_to_ptr.vmem [resolvable:$true] %s21_s13 }
   0x3   :  { %p122_p1 = scmp.lt.u32.totalorder %s118_s16, %s222_s2 }
   0x5   :  { %p124_p2 = pnand %p122_p1, %p119_p0 }
   0x7   :  { %127 = shalt.err (!%p124_p2)
}
   0x8   :  { %s128_s21 = scalar_lea.vmem %s22_s13, 256  ;;  %p133_p4 = scmp.lt.s32.totalorder %s22_s13, %s22_s13 }
   0x9   :  { %p129_p3 = scmp.ne.s32.totalorder %s22_s13, %s128_s21  ;;  %p134_p5 = scmp.lt.s32.totalorder %s128_s21, %s128_s21 }
   0xb   :  { %p135_p6 = por %p134_p5, %p133_p4 }
   0xd   :  { %p136_p7 = pnand %p135_p6, %p129_p3 }
   0xf   :  { %139 = shalt.err (!%p136_p7)
}
  0x10   :  { %s167_s22 = smov 128   ;;  %s168_s23 = smov 8  }
  0x11   :  { %27 = dma.hbm_to_vmem [thread:$0]  %s222_s2, 256, %s22_s13, [#allocation5], %s167_s22, %s167_s22, %s168_s23  }
  0x12   :  { %s33_s28 = ssub.f32 0.0, %s221_s1 }
  0x13   :  { %162 = dma.done.wait [#allocation5], 256  }
  0x14   :  { %163 = vsyncadd [#allocation5], 4294967040  ;;  %v34_v0 = vstv %s33_s28  ;;  %v100_v3 = vld [vmem:[#allocation4] ss:$0 sm:$0xff]  ;;  %v41_v4 = vld [vmem:[#allocation4 + $0x1] sm:$0x7] }
  0x15   :  { %v35_v1 = vmul.f32 1.442695, %v34_v0  ;;  %v101_v5 = vld [vmem:[#allocation4 + $0x4] ss:$0 sm:$0xff]  ;;  %v49_v6 = vld [vmem:[#allocation4 + $0x5] sm:$0x7]  ;;  %v46_v7 = vsub.f32 %v41_v4, %v100_v3 }
  0x16   :  { %v54_v8 = vsub.f32 %v49_v6, %v101_v5  ;;  %v102_v9 = vld [vmem:[#allocation4 + $0x8] ss:$0 sm:$0xff]  ;;  %v58_v10 = vld [vmem:[#allocation4 + $0x9] sm:$0x7]  ;;  %s169_s5 = smov [#allocation7]   ;;  %vm83_vm2 = vcmask 256000  }
  0x17   :  { %110 = vpow2.f32 %v35_v1  ;;  %v47_v11 = vmul.f32 %v46_v7, %v46_v7  ;;  %v63_v13 = vsub.f32 %v58_v10, %v102_v9  ;;  %s91_s6 = sshll.u32 %s169_s5, 4  ;;  %s92_s6 = int_to_ptr.vmem [resolvable:$true] %s91_s6 }
  0x18   :  { %v55_v12 = vmul.f32 %v54_v8, %v54_v8  ;;  %p145_p9 = scmp.lt.s32.totalorder %s92_s6, %s92_s6 }
  0x19   :  { %v64_v15 = vmul.f32 %v63_v13, %v63_v13 }
  0x1a   :  { %v56_v14 = vadd.f32 %v55_v12, %v47_v11 }
  0x1c   :  { %v65_v16 = vadd.f32 %v64_v15, %v56_v14 }
  0x21   :  { %v111_v2 = vpop.eup %110 }
  0x22   :  { %104 = vpush %v111_v2 }
  0x53   :  { %s105_s1 = spop %104 }
  0x54   :  { %s38_s2 = smul.f32 %s105_s1, %s105_s1 }
  0x55   :  { %s39_s4 = smul.f32 %s105_s1, %s220_s0  ;;  %s140_s0 = scalar_lea.vmem %s92_s6, 64 }
  0x56   :  { %v66_v17 = vstv %s38_s2  ;;  %p141_p8 = scmp.ne.s32.totalorder %s92_s6, %s140_s0  ;;  %p146_p10 = scmp.lt.s32.totalorder %s140_s0, %s140_s0 }
  0x57   :  { %v67_v18 = vmul.f32 %v66_v17, %v65_v16  ;;  %v75_v24 = vstv %s39_s4 }
  0x58   :  { %p147_p11 = por %p146_p10, %p145_p9 }
  0x59   :  { %112 = vrsqrt.f32 %v67_v18  ;;  %vm70_vm0 = vcmp.eq.f32.partialorder %v67_v18, inf  ;;  %v73_v21 = vand.u32 2147483648, %v67_v18  ;;  %vm72_vm1 = vcmp.eq.f32.partialorder %v67_v18, 0.0 }
  0x5a   :  { %p148_p12 = pnand %p147_p11, %p141_p8 }
  0x63   :  { %v113_v19 = vpop.eup %112 }
  0x64   :  { %v69_v20 = vmul.f32 %v113_v19, %v67_v18 }
  0x66   :  { %v71_v22 = vsel %vm70_vm0, %v67_v18, %v69_v20 }
  0x67   :  { %v74_v23 = vsel %vm72_vm1, %v73_v21, %v71_v22 }
  0x68   :  { %v76_v25 = vsub.f32 %v75_v24, %v74_v23 }
  0x6a   :  { %v103_v26 = vmul.f32 -1.442695, %v76_v25 }
  0x6c   :  { %114 = vpow2.f32 %v103_v26 }
  0x76   :  { %v115_v27 = vpop.eup %114 }
  0x77   :  { %v80_v28 = vadd.f32 1.0, %v115_v27 }
  0x79   :  { %116 = vrcp.f32 %v80_v28 }
  0x83   :  { %v117_v29 = vpop.eup %116 }
  0x84   :  { %84 = vst.msk [vmem:[#allocation7] sm:$0x7] %vm83_vm2, %v117_v29 }
  0x85   :  { %151 = shalt.err (!%p148_p12)
}
  0x86   :  { %s152_s9 = scalar_lea.hbm %s223_s3, 64 }
  0x87   :  { %p153_p13 = scmp.ne.s32.totalorder %s223_s3, %s152_s9  ;;  %p156_p0 = scmp.lt.u32.totalorder %s152_s9, %s223_s3 }
  0x89   :  { %p158_p1 = pnand %p156_p0, %p153_p13 }
  0x8b   :  { %161 = shalt.err (!%p158_p1)
}
  0x8c   :  { %94 = dma.vmem_to_hbm [thread:$0]  %s92_s6, 64, %s223_s3, [#allocation6]  }
  0x8d   :  { %164 = dma.done.wait [#allocation6], 64  }
  0x8e   :  { %165 = vsyncadd [#allocation6], 4294967232 }
  0x8f   :  { %98 = vsyncpa [#allocation5], 1 }
  0x90   :  { %99 = vsyncpa [#allocation6], 1 }

</bundles_post_ra>
